<compile_context>
chip_gen: v7x
topology: tpu7x:2x2x1
jax: 0.10.0
libtpu: 0.0.40
codegen_flags: <defaults>
</compile_context>

<pallas_src>
import functools

import jax
import jax.numpy as jnp
from jax.experimental import pallas as pl
from jax.experimental.pallas import tpu as pltpu

LANES = 128
_TARGET_BLOCK_BYTES = 4 * 1024 * 1024      # per-input block size target
_MAX_BLOCK_ROWS = 16384                    # caps f32 upcast temporaries
_MIN_ROWS_TO_SPLIT = 64                    # above this, make >=2 tiles (v7x megacore)
_VMEM_LIMIT_BYTES = 48 * 1024 * 1024       # 2 inputs x 2 bufs x 4 MiB + f32 temps


def _round_up(x, m):
    return (x + m - 1) // m * m


def _charbonnier_kernel(pred_ref, tgt_ref, out_ref, *, epsilon, block_rows,
                        num_tiles, valid_in_last, flat):
    p = pred_ref[...]
    t = tgt_ref[...]
    if flat:
        # 1-D (block_rows*128,) block over the unpadded flat input.  1-D vectors
        # are tiled (8,128) row-major, so this reshape is layout-preserving.
        p = p.reshape(block_rows, LANES)
        t = t.reshape(block_rows, LANES)

    diff = p.astype(jnp.float32) - t.astype(jnp.float32)
    val = jnp.sqrt(diff * diff + jnp.float32(epsilon))

    block_elems = block_rows * LANES
    if valid_in_last == block_elems:
        # Input is perfectly tile-aligned: every block is fully valid.
        out_ref[0] = jnp.sum(val, axis=0, keepdims=True)
    else:
        i = pl.program_id(0)
        last = num_tiles - 1

        @pl.when(i < last)
        def _():
            out_ref[0] = jnp.sum(val, axis=0, keepdims=True)

        @pl.when(i == last)
        def _():
            # Only the last block contains out-of-bounds (garbage) data.
            full_rows = valid_in_last // LANES      # complete valid rows
            rem_cols = valid_in_last % LANES        # valid cols in ragged row
            row = jax.lax.broadcasted_iota(jnp.int32, val.shape, 0)
            col = jax.lax.broadcasted_iota(jnp.int32, val.shape, 1)
            valid = row < full_rows
            if rem_cols:
                valid = valid | ((row == full_rows) & (col < rem_cols))
            # Keep the select (jnp.where): multiply-by-mask would propagate
            # NaN/Inf from the masked garbage region.
            out_ref[0] = jnp.sum(jnp.where(valid, val, jnp.float32(0.0)),
                                 axis=0, keepdims=True)


def charbonnier_loss(predictions, targets, epsilon=1e-6):
    assert predictions.shape == targets.shape
    n = int(predictions.size)
    assert n > 0

    # Flatten is a free (bitcast) reshape for contiguous inputs — no HBM copy.
    p = predictions.reshape(-1)
    t = targets.reshape(-1)

    itemsize = jnp.dtype(predictions.dtype).itemsize
    block_rows_max = max(8, min(_MAX_BLOCK_ROWS,
                                _TARGET_BLOCK_BYTES // (LANES * itemsize)))

    total_rows = pl.cdiv(n, LANES)
    if total_rows >= _MIN_ROWS_TO_SPLIT:
        # At least two (roughly balanced) tiles so both v7x TCs get work,
        # capped at the ~4 MiB-per-input block target.
        block_rows = min(block_rows_max, _round_up(pl.cdiv(total_rows, 2), 8))
    else:
        block_rows = total_rows
    block_elems = block_rows * LANES
    num_tiles = pl.cdiv(total_rows, block_rows)
    valid_in_last = n - (num_tiles - 1) * block_elems   # static, tile-local

    flat = (n % LANES) != 0
    if flat:
        # Ragged size: stream the unpadded 1-D array directly (no pad copy).
        inputs = (p, t)
        in_specs = [pl.BlockSpec((block_elems,), lambda i: (i,)),
                    pl.BlockSpec((block_elems,), lambda i: (i,))]
    else:
        # 128-aligned size: free reshape to a lane-dense 2-D view.
        inputs = (p.reshape(total_rows, LANES), t.reshape(total_rows, LANES))
        in_specs = [pl.BlockSpec((block_rows, LANES), lambda i: (i, 0)),
                    pl.BlockSpec((block_rows, LANES), lambda i: (i, 0))]

    kernel = functools.partial(
        _charbonnier_kernel,
        epsilon=float(epsilon),
        block_rows=block_rows,
        num_tiles=num_tiles,
        valid_in_last=valid_in_last,
        flat=flat,
    )

    partials = pl.pallas_call(
        kernel,
        out_shape=jax.ShapeDtypeStruct((num_tiles, 1, LANES), jnp.float32),
        grid_spec=pltpu.PrefetchScalarGridSpec(
            num_scalar_prefetch=0,
            grid=(num_tiles,),
            in_specs=in_specs,
            # Lane-dense VMEM output block: unmasked 128-lane store per tile.
            out_specs=pl.BlockSpec((1, 1, LANES), lambda i: (i, 0, 0)),
        ),
        compiler_params=pltpu.CompilerParams(
            # Independent per-tile partials -> parallel axis (2 TCs on v7x).
            dimension_semantics=("parallel",),
            vmem_limit_bytes=_VMEM_LIMIT_BYTES,
        ),
    )(*inputs)

    # Tiny final reduce (num_tiles x 128 lanes) + mean in the wrapper.
    return jnp.sum(partials) / jnp.float32(n)


def _reference(predictions, targets, epsilon=1e-6):
    diff = predictions.astype(jnp.float32) - targets.astype(jnp.float32)
    return jnp.mean(jnp.sqrt(diff * diff + jnp.float32(epsilon)))


if __name__ == "__main__":
    key = jax.random.PRNGKey(0)

    # Primary test: small NCHW shape matching the PyTorch module usage
    # (128-aligned element count -> 2-D lane-dense path).
    k1, k2 = jax.random.split(key)
    shape = (2, 4, 16, 16)
    predictions = jax.random.normal(k1, shape, dtype=jnp.float32)
    targets = jax.random.normal(k2, shape, dtype=jnp.float32)

    loss = charbonnier_loss(predictions, targets, epsilon=1e-6)
    jax.block_until_ready(loss)
    ref = _reference(predictions, targets, 1e-6)
    assert jnp.allclose(loss, ref, rtol=2e-5, atol=1e-6), (loss, ref)

    # Ragged test: numel not a multiple of 128 -> unpadded 1-D streaming path,
    # exercising the masked final block (partial rows + ragged column tail).
    k3, k4 = jax.random.split(k2)
    shape2 = (2, 4, 130, 130)
    p2 = jax.random.normal(k3, shape2, dtype=jnp.float32)
    t2 = jax.random.normal(k4, shape2, dtype=jnp.float32)
    loss2 = charbonnier_loss(p2, t2, epsilon=1e-6)
    jax.block_until_ready(loss2)
    ref2 = _reference(p2, t2, 1e-6)
    assert jnp.allclose(loss2, ref2, rtol=2e-5, atol=1e-6), (loss2, ref2)

    print("KERNEL_OK")
</pallas_src>

<mosaic_0001>
module attributes {stable_mosaic.version = 11 : i64} {
  func.func @_charbonnier_kernel(%arg0: i32, %arg1: memref<16x128xf32, #tpu.memory_space<vmem>>, %arg2: memref<16x128xf32, #tpu.memory_space<vmem>>, %arg3: memref<1x1x128xf32, #tpu.memory_space<vmem>>) attributes {dimension_semantics = [#tpu.dimension_semantics<parallel>], iteration_bounds = array<i64: 1>, scalar_prefetch = 0 : i64, scratch_operands = 0 : i64, tpu.core_type = #tpu.core_type<tc>, window_params = [{transform_indices = @transform_0, window_bounds = array<i64: 16, 128>}, {transform_indices = @transform_1, window_bounds = array<i64: 16, 128>}, {transform_indices = @transform_2, window_bounds = array<i64: 1, 1, 128>}]} {
    %c0 = arith.constant 0 : index
    %c0_0 = arith.constant 0 : index
    %0 = vector.load %arg1[%c0, %c0_0] : memref<16x128xf32, #tpu.memory_space<vmem>>, vector<16x128xf32>
    %c0_1 = arith.constant 0 : index
    %c0_2 = arith.constant 0 : index
    %1 = vector.load %arg2[%c0_1, %c0_2] : memref<16x128xf32, #tpu.memory_space<vmem>>, vector<16x128xf32>
    %2 = arith.subf %0, %1 : vector<16x128xf32>
    %3 = arith.mulf %2, %2 : vector<16x128xf32>
    %cst = arith.constant 9.99999997E-7 : f32
    %4 = vector.broadcast %cst : f32 to vector<16x128xf32>
    %5 = arith.addf %3, %4 : vector<16x128xf32>
    %6 = math.sqrt %5 : vector<16x128xf32>
    %cst_3 = arith.constant dense<0.000000e+00> : vector<128xf32>
    %7 = vector.multi_reduction <add>, %6, %cst_3 [0] : vector<16x128xf32> to vector<128xf32>
    %8 = vector.shape_cast %7 : vector<128xf32> to vector<1x128xf32>
    %c0_4 = arith.constant 0 : index
    %c0_5 = arith.constant 0 : index
    %c0_6 = arith.constant 0 : index
    %9 = vector.load %arg3[%c0_4, %c0_5, %c0_6] : memref<1x1x128xf32, #tpu.memory_space<vmem>>, vector<1x1x128xf32>
    %10 = vector.shape_cast %9 : vector<1x1x128xf32> to vector<1x128xf32>
    %11 = vector.shape_cast %8 : vector<1x128xf32> to vector<1x1x128xf32>
    tpu.vector_store %arg3[%c0_4, %c0_5, %c0_6], %11 {strides = array<i32>} : memref<1x1x128xf32, #tpu.memory_space<vmem>>, vector<1x1x128xf32>,
    return
  }
  func.func @transform_0(%arg0: i32) -> (i32, i32) {
    %c0_i32 = arith.constant 0 : i32
    %c0_i32_0 = arith.constant 0 : i32
    return %arg0, %c0_i32 : i32, i32
  }
  func.func @transform_1(%arg0: i32) -> (i32, i32) {
    %c0_i32 = arith.constant 0 : i32
    %c0_i32_0 = arith.constant 0 : i32
    return %arg0, %c0_i32 : i32, i32
  }
  func.func @transform_2(%arg0: i32) -> (i32, i32, i32) {
    %c0_i32 = arith.constant 0 : i32
    %c0_i32_0 = arith.constant 0 : i32
    %c0_i32_1 = arith.constant 0 : i32
    return %arg0, %c0_i32, %c0_i32_0 : i32, i32, i32
  }
}

</mosaic_0001>

<bundles_post_ra>
// kernel: tpu_custom_call.1
= control target key start
LH: loop header
LB: loop body
LE: loop exit
PB: predicated region body
PF: predicated region fallthrough
CT: control target
= control target key end

     0   :  { %7 = vsyncpa [#allocation3], 0  ;;  %s225_s0 = inlined_call_operand.hbm [shape: f32[16,128], index: 0, kind: input, shape index: {}]   ;;  %s226_s1 = inlined_call_operand.hbm [shape: f32[16,128], index: 1, kind: input, shape index: {}]   ;;  %s227_s2 = inlined_call_operand.hbm [shape: f32[1,1,128], index: 2, kind: output, shape index: {}]  }
   0x1   :  { %8 = vsyncpa [#allocation6], 0 }
   0x2   :  { %9 = vsyncpa [#allocation4], 0  ;;  %s169_s9 = smov [#allocation2]   ;;  %s97_s13 = scalar_lea.hbm %s225_s0, 256 }
   0x3   :  { %s15_s10 = sshll.u32 %s169_s9, 4  ;;  %p98_p0 = scmp.ne.s32.totalorder %s225_s0, %s97_s13  ;;  %s16_s10 = int_to_ptr.vmem [resolvable:$true] %s15_s10 }
   0x4   :  { %p101_p1 = scmp.lt.u32.totalorder %s97_s13, %s225_s0 }
   0x6   :  { %p103_p2 = pnand %p101_p1, %p98_p0 }
   0x8   :  { %106 = shalt.err (!%p103_p2)
}
   0x9   :  { %s107_s18 = scalar_lea.vmem %s16_s10, 256  ;;  %p112_p4 = scmp.lt.s32.totalorder %s16_s10, %s16_s10 }
   0xa   :  { %p108_p3 = scmp.ne.s32.totalorder %s16_s10, %s107_s18  ;;  %p113_p5 = scmp.lt.s32.totalorder %s107_s18, %s107_s18 }
   0xc   :  { %p114_p6 = por %p113_p5, %p112_p4 }
   0xe   :  { %p115_p7 = pnand %p114_p6, %p108_p3 }
  0x10   :  { %118 = shalt.err (!%p115_p7)
}
  0x11   :  { %s170_s19 = smov 128   ;;  %s171_s20 = smov 8  }
  0x12   :  { %21 = dma.hbm_to_vmem [thread:$0]  %s225_s0, 256, %s16_s10, [#allocation3], %s170_s19, %s170_s19, %s171_s20  }
  0x13   :  { %s172_s23 = smov [#allocation5]   ;;  %s119_s27 = scalar_lea.hbm %s226_s1, 256 }
  0x14   :  { %s27_s24 = sshll.u32 %s172_s23, 4  ;;  %p120_p8 = scmp.ne.s32.totalorder %s226_s1, %s119_s27  ;;  %s28_s24 = int_to_ptr.vmem [resolvable:$true] %s27_s24 }
  0x15   :  { %p123_p9 = scmp.lt.u32.totalorder %s119_s27, %s226_s1 }
  0x17   :  { %p125_p10 = pnand %p123_p9, %p120_p8 }
  0x19   :  { %128 = shalt.err (!%p125_p10)
}
  0x1a   :  { %s129_s4 = scalar_lea.vmem %s28_s24, 256  ;;  %p134_p12 = scmp.lt.s32.totalorder %s28_s24, %s28_s24 }
  0x1b   :  { %p130_p11 = scmp.ne.s32.totalorder %s28_s24, %s129_s4  ;;  %p135_p13 = scmp.lt.s32.totalorder %s129_s4, %s129_s4 }
  0x1d   :  { %p136_p0 = por %p135_p13, %p134_p12 }
  0x1f   :  { %p137_p1 = pnand %p136_p0, %p130_p11 }
  0x21   :  { %140 = shalt.err (!%p137_p1)
}
  0x22   :  { %33 = dma.hbm_to_vmem [thread:$0]  %s226_s1, 256, %s28_s24, [#allocation6], %s170_s19, %s170_s19, %s171_s20  }
  0x23   :  { %163 = dma.done.wait [#allocation3], 256  }
  0x24   :  { %164 = vsyncadd [#allocation3], 4294967040 }
  0x25   :  { %165 = dma.done.wait [#allocation6], 256  }
  0x26   :  { %166 = vsyncadd [#allocation6], 4294967040  ;;  %v40_v0 = vld [vmem:[#allocation2] sm:$0xff]  ;;  %v41_v1 = vld [vmem:[#allocation2 + $0x8] sm:$0xff]  ;;  %s173_s1 = smov [#allocation7]  }
  0x27   :  { %v42_v2 = vld [vmem:[#allocation5] sm:$0xff]  ;;  %v43_v3 = vld [vmem:[#allocation5 + $0x8] sm:$0xff]  ;;  %s78_s6 = sshll.u32 %s173_s1, 4  ;;  %s79_s6 = int_to_ptr.vmem [resolvable:$true] %s78_s6 }
  0x28   :  { %v44_v4 = vsub.f32 %v40_v0, %v42_v2  ;;  %v45_v5 = vsub.f32 %v41_v1, %v43_v3  ;;  %s141_s7 = scalar_lea.vmem %s79_s6, 16  ;;  %s145_s8 = scalar_lea.vmem %s79_s6, 32 }
  0x29   :  { %p142_p2 = scmp.ne.s32.totalorder %s79_s6, %s141_s7  ;;  %p146_p3 = scmp.lt.s32.totalorder %s79_s6, %s79_s6 }
  0x2a   :  { %v46_v6 = vmul.f32 %v44_v4, %v44_v4  ;;  %v47_v7 = vmul.f32 %v45_v5, %v45_v5  ;;  %p147_p4 = scmp.lt.s32.totalorder %s145_s8, %s141_s7 }
  0x2c   :  { %v48_v8 = vadd.f32 1e-06, %v46_v6  ;;  %v49_v9 = vadd.f32 1e-06, %v47_v7  ;;  %p148_p5 = por %p147_p4, %p146_p3 }
  0x2e   :  { %93 = vrsqrt.f32 %v48_v8  ;;  %vm52_vm0 = vcmp.eq.f32.partialorder %v48_v8, inf  ;;  %v55_v11 = vand.u32 2147483648, %v48_v8  ;;  %vm54_vm1 = vcmp.eq.f32.partialorder %v48_v8, 0.0  ;;  %p149_p6 = pnand %p148_p5, %p142_p2 }
  0x2f   :  { %95 = vrsqrt.f32 %v49_v9  ;;  %vm59_vm2 = vcmp.eq.f32.partialorder %v49_v9, inf  ;;  %v62_v14 = vand.u32 2147483648, %v49_v9  ;;  %vm61_vm3 = vcmp.eq.f32.partialorder %v49_v9, 0.0 }
  0x38   :  { %v94_v10 = vpop.eup %93 }
  0x39   :  { %v96_v12 = vpop.eup %95  ;;  %v51_v13 = vmul.f32 %v94_v10, %v48_v8 }
  0x3a   :  { %v58_v15 = vmul.f32 %v96_v12, %v49_v9 }
  0x3b   :  { %v53_v16 = vsel %vm52_vm0, %v48_v8, %v51_v13 }
  0x3c   :  { %v56_v17 = vsel %vm54_vm1, %v55_v11, %v53_v16  ;;  %v60_v18 = vsel %vm59_vm2, %v49_v9, %v58_v15 }
  0x3d   :  { %v63_v19 = vsel %vm61_vm3, %v62_v14, %v60_v18 }
  0x3e   :  { %v64_v20 = vadd.f32 %v63_v19, %v56_v17 }
  0x40   :  { %v65_v21 = vrot.slane %v64_v20, 4 }
  0x42   :  { %v66_v22 = vadd.f32 %v65_v21, %v64_v20 }
  0x44   :  { %v67_v23 = vrot.slane %v66_v22, 2 }
  0x46   :  { %v68_v24 = vadd.f32 %v67_v23, %v66_v22 }
  0x48   :  { %v69_v25 = vrot.slane %v68_v24, 1 }
  0x4a   :  { %v70_v26 = vadd.f32 %v69_v25, %v68_v24 }
  0x4c   :  { %71 = vst [vmem:[#allocation7] sm:$0x1] %v70_v26 }
  0x4d   :  { %152 = shalt.err (!%p149_p6)
}
  0x4e   :  { %s153_s11 = scalar_lea.hbm %s227_s2, 16 }
  0x4f   :  { %p154_p7 = scmp.ne.s32.totalorder %s227_s2, %s153_s11  ;;  %p157_p8 = scmp.lt.u32.totalorder %s153_s11, %s227_s2 }
  0x51   :  { %p159_p9 = pnand %p157_p8, %p154_p7 }
  0x53   :  { %162 = shalt.err (!%p159_p9)
}
  0x54   :  { %81 = dma.vmem_to_hbm [thread:$0]  %s79_s6, 16, %s227_s2, [#allocation4]  }
  0x55   :  { %167 = dma.done.wait [#allocation4], 16  }
  0x56   :  { %168 = vsyncadd [#allocation4], 4294967280 }
  0x57   :  { %85 = vsyncpa [#allocation3], 1 }
  0x58   :  { %86 = vsyncpa [#allocation6], 1 }
  0x59   :  { %87 = vsyncpa [#allocation4], 1 }

</bundles_post_ra>
